<compile_context>
chip_gen: v5e
topology: v5e:2x2
jax: 0.10.0
libtpu: 0.0.40
codegen_flags: <defaults>
</compile_context>

<pallas_src>
import math

import jax
import jax.numpy as jnp
import numpy as np
from jax.experimental import pallas as pl
from jax.experimental.pallas import tpu as pltpu

# ---------------- configuration (small, consistent with the module) ----------
B = 2            # batch
T = 8            # num_tokens (== context_length here)
D_IN = 32        # input feature dim
D_OUT = 32       # output feature dim
NUM_HEADS = 4
HEAD_DIM = D_OUT // NUM_HEADS
HB = NUM_HEADS * B
DROPOUT = 0.0
PAD_OUT = 128    # output lanes padded to a full (..., 128) tile for dense vst


def mha_kernel(x_ref, wqkv_ref, wo_ref, bo_ref, o_ref):
    """Whole batch in one invocation.

    x_ref    : (B*T, D_IN)            bf16
    wqkv_ref : (3*H, D_IN, HEAD_DIM)  bf16  [Wq*scale | Wk | Wv], head-batched
    wo_ref   : (H, HEAD_DIM, 128)     bf16  Wo split per head, lane-padded
    bo_ref   : (1, 128)               f32   lane-padded bias
    o_ref    : (B*T, 128)             f32   lane-dense output slab
    """
    # ---- fused, head-batched QKV projection (one MXU einsum) ---------------
    # Broadcasting x over the (part*head) batch axis lets the projection emit
    # Q/K/V with heads already on the leading dim -> no lane slicing, no
    # transposes, no concats downstream.
    x_b = jnp.broadcast_to(x_ref[...][None], (3 * NUM_HEADS, B * T, D_IN))
    qkvh = jnp.einsum("ptd,pdh->pth", x_b, wqkv_ref[...],
                      preferred_element_type=jnp.float32)       # (3H, B*T, Dh) f32
    # Tile-aligned sublane split (B*T -> B, T); bf16 for the attention MXU ops.
    qkvh = qkvh.astype(jnp.bfloat16).reshape(3 * NUM_HEADS, B, T, HEAD_DIM)

    q = qkvh[:NUM_HEADS].reshape(HB, T, HEAD_DIM)                # (H*B, T, Dh)
    k = qkvh[NUM_HEADS:2 * NUM_HEADS].reshape(HB, T, HEAD_DIM)
    v = qkvh[2 * NUM_HEADS:].reshape(HB, T, HEAD_DIM)

    # ---- causal attention core: one batched matmul + one softmax -----------
    row = jax.lax.broadcasted_iota(jnp.int32, (T, T), 0)
    col = jax.lax.broadcasted_iota(jnp.int32, (T, T), 1)
    allowed = (col <= row)[None, :, :]                           # (1, T, T)

    s = jnp.einsum("bqd,bkd->bqk", q, k,
                   preferred_element_type=jnp.float32)           # (H*B, T, T) f32
    # Safe with -inf: the causal diagonal guarantees >=1 unmasked key per row.
    s = jnp.where(allowed, s, -jnp.inf)

    # Numerically stable softmax, all f32; reciprocal goes to the idle EUP.
    m = jnp.max(s, axis=-1, keepdims=True)
    p = jnp.exp(s - m)
    inv = pl.reciprocal(jnp.sum(p, axis=-1, keepdims=True), approx=True)
    w = (p * inv).astype(jnp.bfloat16)

    ctx = jnp.einsum("bqk,bkd->bqd", w, v,
                     preferred_element_type=jnp.float32)         # (H*B, T, Dh) f32

    # ---- output projection: head-batched matmul, summed over heads ---------
    # (H*B, T, Dh) -> (H, B*T, Dh): leading split + tile-aligned sublane merge.
    ctx_h = ctx.astype(jnp.bfloat16).reshape(NUM_HEADS, B * T, HEAD_DIM)
    out_h = jnp.einsum("htd,hdo->hto", ctx_h, wo_ref[...],
                       preferred_element_type=jnp.float32)       # (H, B*T, 128)
    out = jnp.sum(out_h, axis=0) + bo_ref[...]                   # (B*T, 128) f32

    # Lane-dense (128-lane), unmasked store.
    o_ref[...] = out


def multi_head_attention(x, wqkv_heads, wo_heads_pad, bo_pad):
    """x: (B, T, D_IN) f32; weights pre-restructured on the host (see __main__)."""
    # Pre-flatten x (kills the in-kernel reshape) and feed bf16 to the MXU.
    x2 = x.reshape(B * T, D_IN).astype(jnp.bfloat16)
    out_flat = pl.pallas_call(
        mha_kernel,
        out_shape=jax.ShapeDtypeStruct((B * T, PAD_OUT), jnp.float32),
        grid=(1,),
        in_specs=[
            pl.BlockSpec((B * T, D_IN), lambda i: (0, 0)),
            pl.BlockSpec((3 * NUM_HEADS, D_IN, HEAD_DIM), lambda i: (0, 0, 0)),
            pl.BlockSpec((NUM_HEADS, HEAD_DIM, PAD_OUT), lambda i: (0, 0, 0)),
            pl.BlockSpec((1, PAD_OUT), lambda i: (0, 0)),
        ],
        out_specs=pl.BlockSpec((B * T, PAD_OUT), lambda i: (0, 0)),
        compiler_params=pltpu.CompilerParams(
            dimension_semantics=("arbitrary",)),
    )(x2, wqkv_heads, wo_heads_pad, bo_pad)
    # Drop the lane padding and restore (B, T, D_OUT) outside the kernel
    # (pure XLA slice/reshape on a tiny, row-major-contiguous buffer).
    return out_flat[:, :D_OUT].reshape(B, T, D_OUT).astype(x.dtype)


def reference_mha(x, wq, wk, wv, wo, bo):
    """Pure-JAX f32 reference mirroring the PyTorch forward (unfused weights)."""
    b, t, _ = x.shape
    q = (x @ wq).reshape(b, t, NUM_HEADS, HEAD_DIM).transpose(0, 2, 1, 3)
    k = (x @ wk).reshape(b, t, NUM_HEADS, HEAD_DIM).transpose(0, 2, 1, 3)
    v = (x @ wv).reshape(b, t, NUM_HEADS, HEAD_DIM).transpose(0, 2, 1, 3)
    s = jnp.einsum("bhqd,bhkd->bhqk", q, k) / math.sqrt(HEAD_DIM)
    mask = jnp.triu(jnp.ones((t, t), dtype=bool), k=1)
    s = jnp.where(mask[None, None], -jnp.inf, s)
    w = jax.nn.softmax(s, axis=-1)
    ctx = jnp.einsum("bhqk,bhkd->bhqd", w, v).transpose(0, 2, 1, 3).reshape(b, t, D_OUT)
    return ctx @ wo + bo


if __name__ == "__main__":
    key = jax.random.PRNGKey(0)
    kx, kq, kk, kv, kw, kb = jax.random.split(key, 6)

    x = jax.random.normal(kx, (B, T, D_IN), dtype=jnp.float32)

    # Deterministic parameter init (uniform, Linear-style fan_in scaling).
    def init_w(k, fan_in, shape):
        bound = 1.0 / math.sqrt(fan_in)
        return jax.random.uniform(k, shape, jnp.float32, -bound, bound)

    # Stored pre-transposed: (d_in, d_out)  (torch keeps (d_out, d_in), does x @ W.T)
    wq = init_w(kq, D_IN, (D_IN, D_OUT))
    wk = init_w(kk, D_IN, (D_IN, D_OUT))
    wv = init_w(kv, D_IN, (D_IN, D_OUT))
    wo = init_w(kw, D_OUT, (D_OUT, D_OUT))
    bo = init_w(kb, D_OUT, (1, D_OUT))

    # ---- host-side parameter restructuring (free; outside the kernel) ------
    scale = 1.0 / math.sqrt(HEAD_DIM)

    def to_heads(w):  # (D_IN, H*Dh) -> (H, D_IN, Dh)
        return jnp.transpose(w.reshape(D_IN, NUM_HEADS, HEAD_DIM), (1, 0, 2))

    # [Wq * scale | Wk | Wv], head-batched: index p*H + h -> (D_IN, HEAD_DIM)
    wqkv_heads = jnp.concatenate(
        [to_heads(wq * scale), to_heads(wk), to_heads(wv)], axis=0
    ).astype(jnp.bfloat16)                                       # (3H, D_IN, Dh)

    # Wo split per head and zero-padded to 128 output lanes (lane-dense store).
    wo_heads_pad = jnp.pad(
        wo.reshape(NUM_HEADS, HEAD_DIM, D_OUT),
        ((0, 0), (0, 0), (0, PAD_OUT - D_OUT)),
    ).astype(jnp.bfloat16)                                       # (H, Dh, 128)
    bo_pad = jnp.pad(bo, ((0, 0), (0, PAD_OUT - D_OUT)))         # (1, 128) f32

    out = multi_head_attention(x, wqkv_heads, wo_heads_pad, bo_pad)
    out = jax.block_until_ready(out)

    ref = jax.block_until_ready(reference_mha(x, wq, wk, wv, wo, bo))
    # Tolerance loosened vs f32-exact: bf16 MXU operands (f32 accumulate),
    # the scale folded into Wq, and the approximate (EUP) reciprocal.
    np.testing.assert_allclose(np.asarray(out), np.asarray(ref),
                               rtol=4e-2, atol=4e-2)

    print("KERNEL_OK")
</pallas_src>

<mosaic_0001>
module attributes {stable_mosaic.version = 11 : i64} {
  func.func @mha_kernel(%arg0: i32, %arg1: memref<16x32xbf16, #tpu.memory_space<vmem>>, %arg2: memref<12x32x8xbf16, #tpu.memory_space<vmem>>, %arg3: memref<4x8x128xbf16, #tpu.memory_space<vmem>>, %arg4: memref<1x128xf32, #tpu.memory_space<vmem>>, %arg5: memref<16x128xf32, #tpu.memory_space<vmem>>) attributes {dimension_semantics = [#tpu.dimension_semantics<arbitrary>], iteration_bounds = array<i64: 1>, scalar_prefetch = 0 : i64, scratch_operands = 0 : i64, tpu.core_type = #tpu.core_type<tc>, window_params = [{pipeline_mode = #tpu.pipeline_mode<synchronous>, transform_indices = @transform_0, window_bounds = array<i64: 16, 32>}, {pipeline_mode = #tpu.pipeline_mode<synchronous>, transform_indices = @transform_1, window_bounds = array<i64: 12, 32, 8>}, {pipeline_mode = #tpu.pipeline_mode<synchronous>, transform_indices = @transform_2, window_bounds = array<i64: 4, 8, 128>}, {pipeline_mode = #tpu.pipeline_mode<synchronous>, transform_indices = @transform_3, window_bounds = array<i64: 1, 128>}, {pipeline_mode = #tpu.pipeline_mode<synchronous>, transform_indices = @transform_4, window_bounds = array<i64: 16, 128>}]} {
    %c0 = arith.constant 0 : index
    %c0_0 = arith.constant 0 : index
    %0 = vector.load %arg1[%c0, %c0_0] : memref<16x32xbf16, #tpu.memory_space<vmem>>, vector<16x32xbf16>
    %1 = vector.shape_cast %0 : vector<16x32xbf16> to vector<1x16x32xbf16>
    %2 = vector.shape_cast %1 : vector<1x16x32xbf16> to vector<1x16x32xbf16>
    %3 = vector.broadcast %2 : vector<1x16x32xbf16> to vector<12x16x32xbf16>
    %c0_1 = arith.constant 0 : index
    %c0_2 = arith.constant 0 : index
    %c0_3 = arith.constant 0 : index
    %4 = vector.load %arg2[%c0_1, %c0_2, %c0_3] : memref<12x32x8xbf16, #tpu.memory_space<vmem>>, vector<12x32x8xbf16>
    "tpu.trace_start"() <{level = 10 : i32, message = "ptd,pdh->pth"}> : () -> ()
    %cst = arith.constant dense<0.000000e+00> : vector<12x16x8xf32>
    %5 = tpu.matmul %3, %4, %cst {dimension_numbers = #tpu.dot_dimension_numbers<[2], [1], [1], [2], [0, 0, 0, 1, 1, 2], [0], [0]>} : vector<12x16x32xbf16>, vector<12x32x8xbf16>, vector<12x16x8xf32> -> vector<12x16x8xf32>
    "tpu.trace_stop"() : () -> ()
    %6 = arith.truncf %5 : vector<12x16x8xf32> to vector<12x16x8xbf16>
    %7 = vector.shape_cast %6 : vector<12x16x8xbf16> to vector<12x2x8x8xbf16>
    %8 = vector.extract_strided_slice %7 {offsets = [0, 0, 0, 0], sizes = [4, 2, 8, 8], strides = [1, 1, 1, 1]} : vector<12x2x8x8xbf16> to vector<4x2x8x8xbf16>
    %9 = vector.shape_cast %8 : vector<4x2x8x8xbf16> to vector<8x8x8xbf16>
    %10 = vector.extract_strided_slice %7 {offsets = [4, 0, 0, 0], sizes = [4, 2, 8, 8], strides = [1, 1, 1, 1]} : vector<12x2x8x8xbf16> to vector<4x2x8x8xbf16>
    %11 = vector.shape_cast %10 : vector<4x2x8x8xbf16> to vector<8x8x8xbf16>
    %12 = vector.extract_strided_slice %7 {offsets = [8, 0, 0, 0], sizes = [4, 2, 8, 8], strides = [1, 1, 1, 1]} : vector<12x2x8x8xbf16> to vector<4x2x8x8xbf16>
    %13 = vector.shape_cast %12 : vector<4x2x8x8xbf16> to vector<8x8x8xbf16>
    %14 = tpu.iota {dimensions = array<i32: 0>} : vector<8x8xi32>
    %15 = tpu.iota {dimensions = array<i32: 1>} : vector<8x8xi32>
    %16 = arith.cmpi sle, %15, %14 : vector<8x8xi32>
    %17 = vector.shape_cast %16 : vector<8x8xi1> to vector<1x8x8xi1>
    "tpu.trace_start"() <{level = 10 : i32, message = "bqd,bkd->bqk"}> : () -> ()
    %cst_4 = arith.constant dense<0.000000e+00> : vector<8x8x8xf32>
    %18 = tpu.matmul %9, %11, %cst_4 {dimension_numbers = #tpu.dot_dimension_numbers<[2], [2], [1], [1], [0, 0, 0, 1, 1, 1], [0], [0]>} : vector<8x8x8xbf16>, vector<8x8x8xbf16>, vector<8x8x8xf32> -> vector<8x8x8xf32>
    %cst_5 = arith.constant 0xFF800000 : f32
    "tpu.trace_stop"() : () -> ()
    %19 = vector.shape_cast %17 : vector<1x8x8xi1> to vector<1x8x8xi1>
    %20 = vector.broadcast %19 : vector<1x8x8xi1> to vector<8x8x8xi1>
    %21 = vector.broadcast %cst_5 : f32 to vector<8x8x8xf32>
    %22 = arith.select %20, %18, %21 : vector<8x8x8xi1>, vector<8x8x8xf32>
    %cst_6 = arith.constant dense<0xFF800000> : vector<8x8xf32>
    %23 = vector.multi_reduction <maximumf>, %22, %cst_6 [2] : vector<8x8x8xf32> to vector<8x8xf32>
    %24 = vector.shape_cast %23 : vector<8x8xf32> to vector<8x8x1xf32>
    %25 = vector.broadcast %24 : vector<8x8x1xf32> to vector<8x8x8xf32>
    %26 = arith.subf %22, %25 : vector<8x8x8xf32>
    %27 = math.exp %26 : vector<8x8x8xf32>
    %cst_7 = arith.constant dense<0.000000e+00> : vector<8x8xf32>
    %28 = vector.multi_reduction <add>, %27, %cst_7 [2] : vector<8x8x8xf32> to vector<8x8xf32>
    %29 = vector.shape_cast %28 : vector<8x8xf32> to vector<8x8x1xf32>
    %30 = tpu.reciprocal %29 {approx = true} : vector<8x8x1xf32> -> vector<8x8x1xf32>
    %31 = vector.broadcast %30 : vector<8x8x1xf32> to vector<8x8x8xf32>
    %32 = arith.mulf %27, %31 : vector<8x8x8xf32>
    %33 = arith.truncf %32 : vector<8x8x8xf32> to vector<8x8x8xbf16>
    "tpu.trace_start"() <{level = 10 : i32, message = "bqk,bkd->bqd"}> : () -> ()
    %cst_8 = arith.constant dense<0.000000e+00> : vector<8x8x8xf32>
    %34 = tpu.matmul %33, %13, %cst_8 {dimension_numbers = #tpu.dot_dimension_numbers<[2], [1], [1], [2], [0, 0, 0, 1, 1, 2], [0], [0]>} : vector<8x8x8xbf16>, vector<8x8x8xbf16>, vector<8x8x8xf32> -> vector<8x8x8xf32>
    "tpu.trace_stop"() : () -> ()
    %35 = arith.truncf %34 : vector<8x8x8xf32> to vector<8x8x8xbf16>
    %36 = vector.shape_cast %35 : vector<8x8x8xbf16> to vector<4x16x8xbf16>
    %c0_9 = arith.constant 0 : index
    %c0_10 = arith.constant 0 : index
    %c0_11 = arith.constant 0 : index
    %37 = vector.load %arg3[%c0_9, %c0_10, %c0_11] : memref<4x8x128xbf16, #tpu.memory_space<vmem>>, vector<4x8x128xbf16>
    "tpu.trace_start"() <{level = 10 : i32, message = "htd,hdo->hto"}> : () -> ()
    %cst_12 = arith.constant dense<0.000000e+00> : vector<4x16x128xf32>
    %38 = tpu.matmul %36, %37, %cst_12 {dimension_numbers = #tpu.dot_dimension_numbers<[2], [1], [1], [2], [0, 0, 0, 1, 1, 2], [0], [0]>} : vector<4x16x8xbf16>, vector<4x8x128xbf16>, vector<4x16x128xf32> -> vector<4x16x128xf32>
    "tpu.trace_stop"() : () -> ()
    %cst_13 = arith.constant dense<0.000000e+00> : vector<16x128xf32>
    %39 = vector.multi_reduction <add>, %38, %cst_13 [0] : vector<4x16x128xf32> to vector<16x128xf32>
    %c0_14 = arith.constant 0 : index
    %c0_15 = arith.constant 0 : index
    %40 = vector.load %arg4[%c0_14, %c0_15] : memref<1x128xf32, #tpu.memory_space<vmem>>, vector<1x128xf32>
    %41 = vector.broadcast %40 : vector<1x128xf32> to vector<16x128xf32>
    %42 = arith.addf %39, %41 : vector<16x128xf32>
    %c0_16 = arith.constant 0 : index
    %c0_17 = arith.constant 0 : index
    %43 = vector.load %arg5[%c0_16, %c0_17] : memref<16x128xf32, #tpu.memory_space<vmem>>, vector<16x128xf32>
    tpu.vector_store %arg5[%c0_16, %c0_17], %42 {strides = array<i32>} : memref<16x128xf32, #tpu.memory_space<vmem>>, vector<16x128xf32>,
    return
  }
  func.func @transform_0(%arg0: i32) -> (i32, i32) {
    %c0_i32 = arith.constant 0 : i32
    %c0_i32_0 = arith.constant 0 : i32
    %c0_i32_1 = arith.constant 0 : i32
    return %c0_i32, %c0_i32_0 : i32, i32
  }
  func.func @transform_1(%arg0: i32) -> (i32, i32, i32) {
    %c0_i32 = arith.constant 0 : i32
    %c0_i32_0 = arith.constant 0 : i32
    %c0_i32_1 = arith.constant 0 : i32
    %c0_i32_2 = arith.constant 0 : i32
    return %c0_i32, %c0_i32_0, %c0_i32_1 : i32, i32, i32
  }
  func.func @transform_2(%arg0: i32) -> (i32, i32, i32) {
    %c0_i32 = arith.constant 0 : i32
    %c0_i32_0 = arith.constant 0 : i32
    %c0_i32_1 = arith.constant 0 : i32
    %c0_i32_2 = arith.constant 0 : i32
    return %c0_i32, %c0_i32_0, %c0_i32_1 : i32, i32, i32
  }
  func.func @transform_3(%arg0: i32) -> (i32, i32) {
    %c0_i32 = arith.constant 0 : i32
    %c0_i32_0 = arith.constant 0 : i32
    %c0_i32_1 = arith.constant 0 : i32
    return %c0_i32, %c0_i32_0 : i32, i32
  }
  func.func @transform_4(%arg0: i32) -> (i32, i32) {
    %c0_i32 = arith.constant 0 : i32
    %c0_i32_0 = arith.constant 0 : i32
    %c0_i32_1 = arith.constant 0 : i32
    return %c0_i32, %c0_i32_0 : i32, i32
  }
}

</mosaic_0001>

<bundles_post_ra>
// kernel: tpu_custom_call.1
= control target key start
LH: loop header
LB: loop body
LE: loop exit
PB: predicated region body
PF: predicated region fallthrough
CT: control target
= control target key end

     0   :  { %vm86_vm0 = vcmask 261120   ;;  %s1403_s0 = inlined_call_operand.vmem [shape: bf16[16,32], index: 0, kind: input, shape index: {}]   ;;  %s1404_s1 = inlined_call_operand.vmem [shape: bf16[12,32,8], index: 1, kind: input, shape index: {}]   ;;  %s1405_s2 = inlined_call_operand.vmem [shape: bf16[4,8,128], index: 2, kind: input, shape index: {}]   ;;  %s1406_s3 = inlined_call_operand.vmem [shape: f32[1,128], index: 3, kind: input, shape index: {}]   ;;  %s1407_s4 = inlined_call_operand.hbm [shape: f32[16,128], index: 4, kind: output, shape index: {}]  }
   0x1   :  { %v1109_v0 = vld [vmem:[%s1404_s1 + $0x8] sm:$0xff]  ;;  %v1111_v1 = vld [vmem:[%s1404_s1 + $0x18] sm:$0xff]  ;;  %v1108_v3 = vld [vmem:[%s1404_s1] sm:$0xff] }
   0x2   :  { %v1115_v2 = vld [vmem:[%s1404_s1 + $0x38] sm:$0xff]  ;;  %96 = vmatpush.bf16.msra.mxu0 %v1109_v0  ;;  %122 = vmatpush.bf16.msra.mxu1 %v1111_v1  ;;  %v1110_v4 = vld [vmem:[%s1404_s1 + $0x10] sm:$0xff]  ;;  %v1113_v5 = vld [vmem:[%s1404_s1 + $0x28] sm:$0xff] }
   0x3   :  { %174 = vmatpush.bf16.msra.mxu3 %v1115_v2  ;;  %v1114_v6 = vld [vmem:[%s1404_s1 + $0x30] sm:$0xff]  ;;  %v1117_v7 = vld [vmem:[%s1404_s1 + $0x48] sm:$0xff]  ;;  %148 = vmatpush.bf16.msra.mxu2 %v1113_v5  ;;  %v1112_v8 = vld [vmem:[%s1404_s1 + $0x20] sm:$0xff] }
   0x4   :  { %v1119_v9 = vld [vmem:[%s1404_s1 + $0x58] sm:$0xff]  ;;  %v1107_v10 = vld [vmem:[%s1403_s0] sm:$0xff]  ;;  %v1121_v11 = vld [vmem:[%s1404_s1 + $0x68] sm:$0xff] }
   0x6   :  { %97 = vmatpush.bf16.msra.mxu0 %v1108_v3  ;;  %123 = vmatpush.bf16.msra.mxu1 %v1110_v4 }
   0x7   :  { %9 = vsyncpa [#allocation3], 0  ;;  %175 = vmatpush.bf16.msra.mxu3 %v1114_v6  ;;  %v1123_v12 = vld [vmem:[%s1404_s1 + $0x78] sm:$0xff]  ;;  %149 = vmatpush.bf16.msra.mxu2 %v1112_v8  ;;  %v1116_v13 = vld [vmem:[%s1404_s1 + $0x40] sm:$0xff]  ;;  %vm419_vm1 = vcmask 64512   ;;  %vm681_vm2 = vcmask 1043456  }
   0x8   :  { %v1118_v14 = vld [vmem:[%s1404_s1 + $0x50] sm:$0xff]  ;;  %v1120_v15 = vld [vmem:[%s1404_s1 + $0x60] sm:$0xff]  ;;  %v1129_v17 = vld [vmem:[%s1404_s1 + $0xa8] sm:$0xff]  ;;  %s1194_s19 = smov [#allocation2]   ;;  %s963_s23 = sshll.u32 %s1407_s4, 4  ;;  %s964_s23 = int_to_ptr.hbm [resolvable:$true] %s963_s23 }
   0x9   :  { %987 = vmatmul.msk.bf16.vlgmr.msra.gmra.mxu0 %vm86_vm0, %v1107_v10  ;;  %996 = vmatmul.msk.bf16.vlgmr.msra.gmra.mxu1 %vm86_vm0, %v1107_v10  ;;  %v1122_v16 = vld [vmem:[%s1404_s1 + $0x70] sm:$0xff]  ;;  %v1128_v18 = vld [vmem:[%s1404_s1 + $0xa0] sm:$0xff]  ;;  %v1125_v19 = vld [vmem:[%s1404_s1 + $0x88] sm:$0xff]  ;;  %s961_s20 = sshll.u32 %s1194_s19, 4  ;;  %s1196_s24 = smov 8   ;;  %s962_s20 = int_to_ptr.vmem [resolvable:$true] %s961_s20 }
   0xa   :  { %200 = vmatpush.bf16.msrb.mxu0 %v1117_v7  ;;  %226 = vmatpush.bf16.msrb.mxu1 %v1119_v9  ;;  %v1131_v20 = vld [vmem:[%s1404_s1 + $0xb8] sm:$0xff]  ;;  %v1124_v21 = vld [vmem:[%s1404_s1 + $0x80] sm:$0xff]  ;;  %v1130_v22 = vld [vmem:[%s1404_s1 + $0xb0] sm:$0xff] }
   0xb   :  { %1014 = vmatmul.msk.bf16.vlgmr.msra.gmra.mxu3 %vm86_vm0, %v1107_v10  ;;  %252 = vmatpush.bf16.msrb.mxu2 %v1121_v11  ;;  %v1127_v23 = vld [vmem:[%s1404_s1 + $0x98] sm:$0xff]  ;;  %v1126_v24 = vld [vmem:[%s1404_s1 + $0x90] sm:$0xff] }
   0xc   :  { %1005 = vmatmul.msk.bf16.vlgmr.msra.gmra.mxu2 %vm86_vm0, %v1107_v10  ;;  %278 = vmatpush.bf16.msrb.mxu3 %v1123_v12 }
   0xe   :  { %201 = vmatpush.bf16.msrb.mxu0 %v1116_v13  ;;  %227 = vmatpush.bf16.msrb.mxu1 %v1118_v14 }
   0xf   :  { %253 = vmatpush.bf16.msrb.mxu2 %v1120_v15 }
  0x10   :  { %279 = vmatpush.bf16.msrb.mxu3 %v1122_v16 }
  0x12   :  { %304 = vmatpush.bf16.msra.mxu0 %v1125_v19  ;;  %330 = vmatpush.bf16.msra.mxu1 %v1127_v23 }
  0x13   :  { %356 = vmatpush.bf16.msra.mxu2 %v1129_v17 }
  0x14   :  { %382 = vmatpush.bf16.msra.mxu3 %v1131_v20 }
  0x16   :  { %305 = vmatpush.bf16.msra.mxu0 %v1124_v21  ;;  %331 = vmatpush.bf16.msra.mxu1 %v1126_v24 }
  0x17   :  { %357 = vmatpush.bf16.msra.mxu2 %v1128_v18 }
  0x18   :  { %383 = vmatpush.bf16.msra.mxu3 %v1130_v22 }
  0x19   :  { %1023 = vmatmul.msk.bf16.vlgmr.msrb.gmra.mxu0 %vm86_vm0, %v1107_v10  ;;  %1032 = vmatmul.msk.bf16.vlgmr.msrb.gmra.mxu1 %vm86_vm0, %v1107_v10 }
  0x1b   :  { %1050 = vmatmul.msk.bf16.vlgmr.msrb.gmra.mxu3 %vm86_vm0, %v1107_v10 }
  0x1c   :  { %1041 = vmatmul.msk.bf16.vlgmr.msrb.gmra.mxu2 %vm86_vm0, %v1107_v10 }
  0x29   :  { %1059 = vmatmul.msk.bf16.vlgmr.msra.gmra.mxu0 %vm86_vm0, %v1107_v10  ;;  %1068 = vmatmul.msk.bf16.vlgmr.msra.gmra.mxu1 %vm86_vm0, %v1107_v10 }
  0x2b   :  { %1086 = vmatmul.msk.bf16.vlgmr.msra.gmra.mxu3 %vm86_vm0, %v1107_v10 }
  0x2c   :  { %1077 = vmatmul.msk.bf16.vlgmr.msra.gmra.mxu2 %vm86_vm0, %v1107_v10 }
  0x86   :  { %v99_v25 = vpop.f32.mrf.mxu0  ;;  %v125_v26 = vpop.f32.mrf.mxu1 }
  0x87   :  { %v390_v43 = vpack.c.bf16 %v99_v25, %v99_v25  ;;  %v392_v44 = vpack.c.bf16 %v125_v26, %v125_v26  ;;  %v414_v25 = vlaneseq }
  0x89   :  { %v415_v26 = vshrl.u32 %v414_v25, 7 }
  0x8e   :  { %v177_v27 = vpop.f32.mrf.mxu3  ;;  %v101_v28 = vpop.f32.mrf.mxu0 }
  0x8f   :  { %v127_v29 = vpop.f32.mrf.mxu1  ;;  %v151_v30 = vpop.f32.mrf.mxu2  ;;  %v391_v55 = vpack.c.bf16 %v101_v28, %v101_v28  ;;  %v396_v61 = vpack.c.bf16 %v177_v27, %v177_v27  ;;  %v417_v27 = vand.u32 127, %v414_v25 }
  0x90   :  { %v393_v56 = vpack.c.bf16 %v127_v29, %v127_v29  ;;  %v394_v62 = vpack.c.bf16 %v151_v30, %v151_v30 }
  0x91   :  { %vm1333_vm3 = vcmp.le.s32.totalorder %v417_v27, %v415_v26 }
  0x96   :  { %v179_v31 = vpop.f32.mrf.mxu3  ;;  %v203_v32 = vpop.f32.mrf.mxu0 }
  0x97   :  { %v229_v33 = vpop.f32.mrf.mxu1  ;;  %v398_v34 = vpack.c.bf16 %v203_v32, %v203_v32  ;;  %v153_v36 = vpop.f32.mrf.mxu2  ;;  %v397_v63 = vpack.c.bf16 %v179_v31, %v179_v31 }
  0x98   :  { %v400_v35 = vpack.c.bf16 %v229_v33, %v229_v33  ;;  %v395_v0 = vpack.c.bf16 %v153_v36, %v153_v36 }
  0x99   :  { %v424_v37 = vsel %vm419_vm1, %v398_v34, 0 }
  0x9a   :  { %v462_v38 = vsel %vm419_vm1, %v400_v35, 0  ;;  %433 = vmatpush.bf16.xpose.msrb.mxu0 %v424_v37 }
  0x9b   :  { %471 = vmatpush.bf16.xpose.msrb.mxu2 %v462_v38 }
  0x9e   :  { %v281_v39 = vpop.f32.mrf.mxu3  ;;  %v205_v40 = vpop.f32.mrf.mxu0 }
  0x9f   :  { %v231_v41 = vpop.f32.mrf.mxu1  ;;  %v404_v42 = vpack.c.bf16 %v281_v39, %v281_v39  ;;  %v399_v45 = vpack.c.bf16 %v205_v40, %v205_v40  ;;  %v255_v47 = vpop.f32.mrf.mxu2 }
  0xa0   :  { %v401_v46 = vpack.c.bf16 %v231_v41, %v231_v41  ;;  %v402_v49 = vpack.c.bf16 %v255_v47, %v255_v47 }
  0xa1   :  { %v538_v48 = vsel %vm419_vm1, %v404_v42, 0  ;;  %v443_v50 = vsel %vm419_vm1, %v399_v45, 0  ;;  %1087 = vmatmul.msk.bf16.vlgmr.msrb.gmra.mxu0 %vm419_vm1, %v390_v43 }
  0xa2   :  { %v481_v51 = vsel %vm419_vm1, %v401_v46, 0  ;;  %1089 = vmatmul.msk.bf16.vlgmr.msrb.gmra.mxu2 %vm419_vm1, %v392_v44  ;;  %452 = vmatpush.bf16.xpose.msrb.mxu1 %v443_v50  ;;  %v500_v52 = vsel %vm419_vm1, %v402_v49, 0 }
  0xa3   :  { %490 = vmatpush.bf16.xpose.msrb.mxu3 %v481_v51  ;;  %509 = vmatpush.bf16.xpose.msra.mxu0 %v500_v52 }
  0xa4   :  { %547 = vmatpush.bf16.xpose.msra.mxu2 %v538_v48 }
  0xa6   :  { %v283_v53 = vpop.f32.mrf.mxu3  ;;  %v307_v1 = vpop.f32.mrf.mxu0 }
  0xa7   :  { %v405_v54 = vpack.c.bf16 %v283_v53, %v283_v53  ;;  %v257_v57 = vpop.f32.mrf.mxu2  ;;  %v406_v2 = vpack.c.bf16 %v307_v1, %v307_v1  ;;  %v333_v8 = vpop.f32.mrf.mxu1 }
  0xa8   :  { %v403_v59 = vpack.c.bf16 %v257_v57, %v257_v57  ;;  %v408_v10 = vpack.c.bf16 %v333_v8, %v333_v8 }
  0xa9   :  { %v557_v58 = vsel %vm419_vm1, %v405_v54, 0  ;;  %1088 = vmatmul.msk.bf16.vlgmr.msrb.gmra.mxu1 %vm419_vm1, %v391_v55  ;;  %v683_v5 = vsel %vm681_vm2, %v406_v2, 0 }
  0xaa   :  { %1090 = vmatmul.msk.bf16.vlgmr.msrb.gmra.mxu3 %vm419_vm1, %v393_v56  ;;  %v519_v60 = vsel %vm419_vm1, %v403_v59, 0  ;;  %v721_v16 = vsel %vm681_vm2, %v408_v10, 0 }
  0xab   :  { %566 = vmatpush.bf16.xpose.msra.mxu3 %v557_v58  ;;  %528 = vmatpush.bf16.xpose.msra.mxu1 %v519_v60 }
  0xac   :  { %692 = vmatpush.bf16.msrb.mxu0 %v683_v5  ;;  %730 = vmatpush.bf16.msrb.mxu2 %v721_v16 }
  0xae   :  { %v309_v7 = vpop.f32.mrf.mxu0  ;;  %v385_v12 = vpop.f32.mrf.mxu3 }
  0xaf   :  { %v359_v3 = vpop.f32.mrf.mxu2  ;;  %v407_v9 = vpack.c.bf16 %v309_v7, %v309_v7  ;;  %v412_v14 = vpack.c.bf16 %v385_v12, %v385_v12  ;;  %v335_v19 = vpop.f32.mrf.mxu1 }
  0xb0   :  { %v410_v4 = vpack.c.bf16 %v359_v3, %v359_v3  ;;  %v409_v20 = vpack.c.bf16 %v335_v19, %v335_v19 }
  0xb1   :  { %1091 = vmatmul.msk.bf16.vlgmr.msra.gmra.mxu0 %vm419_vm1, %v394_v62  ;;  %v702_v15 = vsel %vm681_vm2, %v407_v9, 0  ;;  %v797_v18 = vsel %vm681_vm2, %v412_v14, 0 }
  0xb2   :  { %1093 = vmatmul.msk.bf16.vlgmr.msra.gmra.mxu2 %vm419_vm1, %v396_v61  ;;  %v759_v6 = vsel %vm681_vm2, %v410_v4, 0  ;;  %v740_v23 = vsel %vm681_vm2, %v409_v20, 0 }
  0xb3   :  { %768 = vmatpush.bf16.msra.mxu0 %v759_v6  ;;  %711 = vmatpush.bf16.msrb.mxu1 %v702_v15 }
  0xb4   :  { %806 = vmatpush.bf16.msra.mxu2 %v797_v18  ;;  %749 = vmatpush.bf16.msrb.mxu3 %v740_v23 }
  0xb6   :  { %v387_v21 = vpop.f32.mrf.mxu3 }
  0xb7   :  { %v361_v11 = vpop.f32.mrf.mxu2  ;;  %v413_v22 = vpack.c.bf16 %v387_v21, %v387_v21 }
  0xb8   :  { %v411_v13 = vpack.c.bf16 %v361_v11, %v361_v11 }
  0xb9   :  { %1092 = vmatmul.msk.bf16.vlgmr.msra.gmra.mxu1 %vm419_vm1, %v395_v0  ;;  %v816_v24 = vsel %vm681_vm2, %v413_v22, 0 }
  0xba   :  { %1094 = vmatmul.msk.bf16.vlgmr.msra.gmra.mxu3 %vm419_vm1, %v397_v63  ;;  %v778_v17 = vsel %vm681_vm2, %v411_v13, 0 }
  0xbb   :  { %787 = vmatpush.bf16.msra.mxu1 %v778_v17  ;;  %825 = vmatpush.bf16.msra.mxu3 %v816_v24 }
 0x11e   :  { %v435_v29 = vpop.f32.mrf.mxu0 }
 0x11f   :  { %v574_v30 = vsel %vm1333_vm3, %v435_v29, -inf }
 0x120   :  { %v582_v31 = vsel %vm419_vm1, %v574_v30, -inf }
 0x121   :  { %583 = vmax.xlane.f32.xlu1 %v582_v31 }
 0x125   :  { %v473_v32 = vpop.f32.mrf.mxu2 }
 0x126   :  { %v576_v33 = vsel %vm1333_vm3, %v473_v32, -inf  ;;  %v437_v34 = vpop.f32.mrf.mxu0  ;;  %v454_v35 = vpop.f32.mrf.mxu1 }
 0x127   :  { %v588_v36 = vsel %vm419_vm1, %v576_v33, -inf  ;;  %v575_v37 = vsel %vm1333_vm3, %v454_v35, -inf }
 0x128   :  { %589 = vmax.xlane.f32.xlu0 %v588_v36  ;;  %v585_v38 = vsel %vm419_vm1, %v575_v37, -inf }
 0x129   :  { %586 = vmax.xlane.f32.xlu1 %v585_v38 }
 0x12d   :  { %v475_v39 = vpop.f32.mrf.mxu2  ;;  %v492_v40 = vpop.f32.mrf.mxu3 }
 0x12e   :  { %v577_v41 = vsel %vm1333_vm3, %v492_v40, -inf  ;;  %v456_v42 = vpop.f32.mrf.mxu1  ;;  %v511_v43 = vpop.f32.mrf.mxu0 }
 0x12f   :  { %v591_v44 = vsel %vm419_vm1, %v577_v41, -inf  ;;  %v578_v45 = vsel %vm1333_vm3, %v511_v43, -inf }
 0x130   :  { %592 = vmax.xlane.f32.xlu0 %v591_v44  ;;  %v594_v52 = vsel %vm419_vm1, %v578_v45, -inf }
 0x135   :  { %v494_v46 = vpop.f32.mrf.mxu3  ;;  %v549_v47 = vpop.f32.mrf.mxu2 }
 0x136   :  { %v580_v48 = vsel %vm1333_vm3, %v549_v47, -inf  ;;  %v513_v49 = vpop.f32.mrf.mxu0  ;;  %v530_v50 = vpop.f32.mrf.mxu1 }
 0x137   :  { %v600_v51 = vsel %vm419_vm1, %v580_v48, -inf  ;;  %v579_v53 = vsel %vm1333_vm3, %v530_v50, -inf }
 0x138   :  { %601 = vmax.xlane.f32.xlu2 %v600_v51  ;;  %595 = vmax.xlane.f32.xlu0 %v594_v52  ;;  %v597_v54 = vsel %vm419_vm1, %v579_v53, -inf }
 0x139   :  { %598 = vmax.xlane.f32.xlu1 %v597_v54 }
 0x13d   :  { %v551_v55 = vpop.f32.mrf.mxu2  ;;  %v568_v56 = vpop.f32.mrf.mxu3 }
 0x13e   :  { %v581_v57 = vsel %vm1333_vm3, %v568_v56, -inf  ;;  %v532_v58 = vpop.f32.mrf.mxu1 }
 0x13f   :  { %v603_v59 = vsel %vm419_vm1, %v581_v57, -inf }
 0x140   :  { %604 = vmax.xlane.f32.xlu2 %v603_v59 }
 0x145   :  { %v570_v60 = vpop.f32.mrf.mxu3 }
 0x194   :  { %v584_v61 = vpop.xlane.xlu1 %583 }
 0x195   :  { %v606_v62 = vsub.f32 %v574_v30, %v584_v61 }
 0x197   :  { %v614_v63 = vmul.f32 1.442695, %v606_v62 }
 0x199   :  { %1136 = vpow2.f32 %v614_v63 }
 0x19b   :  { %v590_v0 = vpop.xlane.xlu0 %589 }
 0x19c   :  { %v608_v1 = vsub.f32 %v576_v33, %v590_v0  ;;  %v587_v2 = vpop.xlane.xlu1 %586 }
 0x19d   :  { %v607_v4 = vsub.f32 %v575_v37, %v587_v2 }
 0x19e   :  { %v618_v3 = vmul.f32 1.442695, %v608_v1 }
 0x19f   :  { %v1137_v5 = vpop.eup %1136  ;;  %v616_v7 = vmul.f32 1.442695, %v607_v4 }
 0x1a0   :  { %1138 = vpow2.f32 %v618_v3  ;;  %v630_v6 = vsel %vm419_vm1, %v1137_v5, 0.0 }
 0x1a1   :  { %631 = vadd.xlane.f32.xlu1 %v630_v6  ;;  %1140 = vpow2.f32 %v616_v7  ;;  %v840_v7 = vld [vmem:[%s1405_s2 + $0x4] sm:$0xf] }
 0x1a3   :  { %v593_v8 = vpop.xlane.xlu0 %592 }
 0x1a4   :  { %v609_v9 = vsub.f32 %v577_v41, %v593_v8  ;;  %v877_v8 = vsel %vm681_vm2, %v840_v7, 0 }
 0x1a6   :  { %v1139_v10 = vpop.eup %1138  ;;  %v620_v11 = vmul.f32 1.442695, %v609_v9 }
 0x1a7   :  { %v636_v12 = vsel %vm419_vm1, %v1139_v10, 0.0  ;;  %v1141_v15 = vpop.eup %1140 }
 0x1a8   :  { %1142 = vpow2.f32 %v620_v11  ;;  %637 = vadd.xlane.f32.xlu2 %v636_v12  ;;  %v633_v23 = vsel %vm419_vm1, %v1141_v15, 0.0  ;;  %v842_v12 = vld [vmem:[%s1405_s2 + $0xc] sm:$0xf] }
 0x1ab   :  { %v602_v13 = vpop.xlane.xlu2 %601  ;;  %v596_v14 = vpop.xlane.xlu0 %595 }
 0x1ac   :  { %v612_v16 = vsub.f32 %v580_v48, %v602_v13  ;;  %v610_v17 = vsub.f32 %v578_v45, %v596_v14  ;;  %v599_v18 = vpop.xlane.xlu1 %598  ;;  %v927_v14 = vsel %vm681_vm2, %v842_v12, 0 }
 0x1ad   :  { %v611_v22 = vsub.f32 %v579_v53, %v599_v18 }
 0x1ae   :  { %v1143_v19 = vpop.eup %1142  ;;  %v626_v20 = vmul.f32 1.442695, %v612_v16  ;;  %v622_v21 = vmul.f32 1.442695, %v610_v17 }
 0x1af   :  { %v639_v24 = vsel %vm419_vm1, %v1143_v19, 0.0  ;;  %v624_v25 = vmul.f32 1.442695, %v611_v22 }
 0x1b0   :  { %1144 = vpow2.f32 %v626_v20  ;;  %634 = vadd.xlane.f32.xlu2 %v633_v23  ;;  %640 = vadd.xlane.f32.xlu0 %v639_v24 }
 0x1b1   :  { %1146 = vpow2.f32 %v622_v21 }
 0x1b2   :  { %1148 = vpow2.f32 %v624_v25 }
 0x1b3   :  { %v605_v26 = vpop.xlane.xlu2 %604 }
 0x1b4   :  { %v613_v27 = vsub.f32 %v581_v57, %v605_v26 }
 0x1b6   :  { %v1145_v28 = vpop.eup %1144  ;;  %v628_v29 = vmul.f32 1.442695, %v613_v27 }
 0x1b7   :  { %v1147_v30 = vpop.eup %1146  ;;  %v648_v31 = vsel %vm419_vm1, %v1145_v28, 0.0 }
 0x1b8   :  { %1150 = vpow2.f32 %v628_v29  ;;  %649 = vadd.xlane.f32.xlu0 %v648_v31  ;;  %v642_v32 = vsel %vm419_vm1, %v1147_v30, 0.0  ;;  %v1149_v33 = vpop.eup %1148 }
 0x1b9   :  { %643 = vadd.xlane.f32.xlu2 %v642_v32  ;;  %v645_v36 = vsel %vm419_vm1, %v1149_v33, 0.0 }
 0x1be   :  { %v1151_v34 = vpop.eup %1150 }
 0x1bf   :  { %v651_v35 = vsel %vm419_vm1, %v1151_v34, 0.0 }
 0x1c0   :  { %652 = vadd.xlane.f32.xlu1 %v651_v35  ;;  %646 = vadd.xlane.f32.xlu0 %v645_v36 }
 0x214   :  { %v632_v37 = vpop.xlane.xlu1 %631 }
 0x215   :  { %1152 = vrcp.f32 %v632_v37 }
 0x21b   :  { %v638_v38 = vpop.xlane.xlu2 %637  ;;  %v1153_v39 = vpop.eup %1152 }
 0x21c   :  { %1154 = vrcp.f32 %v638_v38  ;;  %v662_v40 = vmul.f32 %v1153_v39, %v1137_v5  ;;  %v839_v5 = vld [vmem:[%s1405_s2] sm:$0xf] }
 0x21d   :  { %v852_v6 = vsel %vm681_vm2, %v839_v5, 0 }
 0x21e   :  { %v670_v41 = vpack.c.bf16 %v662_v40, %v662_v40 }
 0x220   :  { %1095 = vmatmul.msk.bf16.vlgmr.msrb.gmra.mxu0 %vm419_vm1, %v670_v41 }
 0x221   :  { %861 = vmatpush.bf16.msrb.mxu0 %v852_v6 }
 0x222   :  { %v1155_v42 = vpop.eup %1154 }
 0x223   :  { %v664_v43 = vmul.f32 %v1155_v42, %v1139_v10  ;;  %v635_v44 = vpop.xlane.xlu2 %634  ;;  %v641_v45 = vpop.xlane.xlu0 %640  ;;  %v841_v10 = vld [vmem:[%s1405_s2 + $0x8] sm:$0xf] }
 0x224   :  { %1156 = vrcp.f32 %v635_v44  ;;  %v902_v11 = vsel %vm681_vm2, %v841_v10, 0 }
 0x225   :  { %v672_v46 = vpack.c.bf16 %v664_v43, %v664_v43  ;;  %1158 = vrcp.f32 %v641_v45 }
 0x227   :  { %1097 = vmatmul.msk.bf16.vlgmr.msrb.gmra.mxu2 %vm419_vm1, %v672_v46 }
 0x228   :  { %911 = vmatpush.bf16.msrb.mxu2 %v902_v11 }
 0x22a   :  { %v1157_v47 = vpop.eup %1156 }
 0x22b   :  { %v1159_v48 = vpop.eup %1158  ;;  %v663_v49 = vmul.f32 %v1157_v47, %v1141_v15  ;;  %v650_v50 = vpop.xlane.xlu0 %649 }
 0x22c   :  { %v665_v51 = vmul.f32 %v1159_v48, %v1143_v19  ;;  %v644_v52 = vpop.xlane.xlu2 %643  ;;  %1160 = vrcp.f32 %v650_v50 }
 0x22d   :  { %v671_v53 = vpack.c.bf16 %v663_v49, %v663_v49  ;;  %1162 = vrcp.f32 %v644_v52 }
 0x22e   :  { %v673_v54 = vpack.c.bf16 %v665_v51, %v665_v51 }
 0x22f   :  { %1096 = vmatmul.msk.bf16.vlgmr.msrb.gmra.mxu1 %vm419_vm1, %v671_v53 }
 0x230   :  { %1098 = vmatmul.msk.bf16.vlgmr.msrb.gmra.mxu3 %vm419_vm1, %v673_v54  ;;  %886 = vmatpush.bf16.msrb.mxu1 %v877_v8  ;;  %v1135_v54 = vld [vmem:[%s1406_s3] ss:$0 sm:$0xff]  ;;  %s1195_s3 = smov 128  }
 0x231   :  { %936 = vmatpush.bf16.msrb.mxu3 %v927_v14 }
 0x232   :  { %v1161_v55 = vpop.eup %1160 }
 0x233   :  { %v1163_v56 = vpop.eup %1162  ;;  %v668_v57 = vmul.f32 %v1161_v55, %v1145_v28  ;;  %v653_v58 = vpop.xlane.xlu1 %652 }
 0x234   :  { %v647_v59 = vpop.xlane.xlu0 %646  ;;  %v666_v60 = vmul.f32 %v1163_v56, %v1147_v30  ;;  %1164 = vrcp.f32 %v653_v58 }
 0x235   :  { %v676_v61 = vpack.c.bf16 %v668_v57, %v668_v57  ;;  %1166 = vrcp.f32 %v647_v59 }
 0x236   :  { %v674_v62 = vpack.c.bf16 %v666_v60, %v666_v60 }
 0x237   :  { %1101 = vmatmul.msk.bf16.vlgmr.msra.gmra.mxu2 %vm419_vm1, %v676_v61 }
 0x238   :  { %1099 = vmatmul.msk.bf16.vlgmr.msra.gmra.mxu0 %vm419_vm1, %v674_v62 }
 0x23a   :  { %v1165_v63 = vpop.eup %1164 }
 0x23b   :  { %v1167_v0 = vpop.eup %1166  ;;  %v669_v1 = vmul.f32 %v1165_v63, %v1151_v34 }
 0x23c   :  { %v667_v2 = vmul.f32 %v1167_v0, %v1149_v33 }
 0x23d   :  { %v677_v3 = vpack.c.bf16 %v669_v1, %v669_v1 }
 0x23e   :  { %v675_v4 = vpack.c.bf16 %v667_v2, %v667_v2 }
 0x240   :  { %1100 = vmatmul.msk.bf16.vlgmr.msra.gmra.mxu1 %vm419_vm1, %v675_v4  ;;  %1102 = vmatmul.msk.bf16.vlgmr.msra.gmra.mxu3 %vm419_vm1, %v677_v3 }
 0x29d   :  { %v694_v9 = vpop.f32.mrf.mxu0 }
 0x29e   :  { %v831_v16 = vpack.c.bf16 %v694_v9, %v694_v9 }
 0x2a0   :  { %v845_v19 = vunpack.c.l.b16 %v831_v16 }
 0x2a5   :  { %v696_v13 = vpop.f32.mrf.mxu0 }
 0x2aa   :  { %v732_v15 = vpop.f32.mrf.mxu2 }
 0x2ab   :  { %v833_v22 = vpack.c.bf16 %v732_v15, %v732_v15 }
 0x2ac   :  { %v713_v17 = vpop.f32.mrf.mxu1 }
 0x2ad   :  { %v832_v18 = vpack.c.bf16 %v713_v17, %v713_v17  ;;  %v870_v28 = vunpack.c.l.b16 %v833_v22 }
 0x2af   :  { %v846_v20 = vunpack.c.l.b16 %v832_v18 }
 0x2b1   :  { %v847_v21 = vpack.c.b16 %v846_v20, %v845_v19 }
 0x2b2   :  { %v734_v23 = vpop.f32.mrf.mxu2 }
 0x2b3   :  { %v751_v24 = vpop.f32.mrf.mxu3  ;;  %1103 = vmatmul.msk.bf16.vlgmr.msrb.gmra.mxu0 %vm419_vm1, %v847_v21 }
 0x2b4   :  { %v834_v25 = vpack.c.bf16 %v751_v24, %v751_v24  ;;  %v715_v26 = vpop.f32.mrf.mxu1 }
 0x2b5   :  { %v770_v27 = vpop.f32.mrf.mxu0 }
 0x2b6   :  { %v871_v29 = vunpack.c.l.b16 %v834_v25  ;;  %v835_v33 = vpack.c.bf16 %v770_v27, %v770_v27 }
 0x2b8   :  { %v872_v30 = vpack.c.b16 %v871_v29, %v870_v28  ;;  %v895_v37 = vunpack.c.l.b16 %v835_v33 }
 0x2ba   :  { %1104 = vmatmul.msk.bf16.vlgmr.msrb.gmra.mxu1 %vm419_vm1, %v872_v30  ;;  %v808_v31 = vpop.f32.mrf.mxu2 }
 0x2bb   :  { %v753_v32 = vpop.f32.mrf.mxu3  ;;  %v837_v39 = vpack.c.bf16 %v808_v31, %v808_v31 }
 0x2bd   :  { %v772_v34 = vpop.f32.mrf.mxu0  ;;  %v789_v35 = vpop.f32.mrf.mxu1  ;;  %v920_v45 = vunpack.c.l.b16 %v837_v39 }
 0x2be   :  { %v836_v36 = vpack.c.bf16 %v789_v35, %v789_v35 }
 0x2c0   :  { %v896_v38 = vunpack.c.l.b16 %v836_v36 }
 0x2c2   :  { %v897_v40 = vpack.c.b16 %v896_v38, %v895_v37  ;;  %v810_v41 = vpop.f32.mrf.mxu2 }
 0x2c3   :  { %v827_v42 = vpop.f32.mrf.mxu3 }
 0x2c4   :  { %v838_v43 = vpack.c.bf16 %v827_v42, %v827_v42  ;;  %1105 = vmatmul.msk.bf16.vlgmr.msrb.gmra.mxu2 %vm419_vm1, %v897_v40 }
 0x2c5   :  { %v791_v44 = vpop.f32.mrf.mxu1 }
 0x2c6   :  { %v921_v46 = vunpack.c.l.b16 %v838_v43 }
 0x2c8   :  { %v922_v47 = vpack.c.b16 %v921_v46, %v920_v45 }
 0x2ca   :  { %1106 = vmatmul.msk.bf16.vlgmr.msrb.gmra.mxu3 %vm419_vm1, %v922_v47 }
 0x2cb   :  { %v829_v48 = vpop.f32.mrf.mxu3 }
 0x330   :  { %v863_v50 = vpop.f32.mrf.mxu0 }
 0x337   :  { %v888_v49 = vpop.f32.mrf.mxu1 }
 0x338   :  { %v943_v52 = vadd.f32 %v888_v49, %v863_v50  ;;  %v865_v59 = vpop.f32.mrf.mxu0 }
 0x33f   :  { %v890_v57 = vpop.f32.mrf.mxu1 }
 0x340   :  { %v946_v61 = vadd.f32 %v890_v57, %v865_v59 }
 0x347   :  { %v913_v51 = vpop.f32.mrf.mxu2 }
 0x348   :  { %v944_v53 = vadd.f32 %v943_v52, %v913_v51 }
 0x34d   :  { %v938_v55 = vpop.f32.mrf.mxu3 }
 0x34e   :  { %v945_v56 = vadd.f32 %v944_v53, %v938_v55 }
 0x34f   :  { %v915_v60 = vpop.f32.mrf.mxu2 }
 0x350   :  { %v953_v58 = vadd.f32 %v1135_v54, %v945_v56  ;;  %v947_v62 = vadd.f32 %v946_v61, %v915_v60 }
 0x352   :  { %955 = vst [vmem:[#allocation2] sm:$0xff] %v953_v58 }
 0x355   :  { %v940_v63 = vpop.f32.mrf.mxu3 }
 0x356   :  { %v948_v0 = vadd.f32 %v947_v62, %v940_v63 }
 0x358   :  { %v954_v1 = vadd.f32 %v1135_v54, %v948_v0 }
 0x35a   :  { %956 = vst [vmem:[#allocation2 + $0x8] sm:$0xff] %v954_v1 }
 0x35b   :  { %969 = dma.vmem_to_hbm [thread:$0]  %s962_s20, 256, %s964_s23, [#allocation3], %s1195_s3, %s1195_s3, %s1196_s24  }
 0x35c   :  { %1192 = dma.done.wait [#allocation3], 256  }
 0x35d   :  { %1193 = vsyncadd [#allocation3], 4294967040 }
 0x35e   :  { %974 = vsyncpa [#allocation3], 1 }

</bundles_post_ra>
